<compile_context>
chip_gen: v7x
topology: tpu7x:2x2x1
jax: 0.10.0
libtpu: 0.0.40
codegen_flags: <defaults>
</compile_context>

<pallas_src>
import functools

import jax
import jax.numpy as jnp
from jax.experimental import pallas as pl
from jax.experimental.pallas import tpu as pltpu


def _round_up(x, m):
    return ((x + m - 1) // m) * m


def _pick_tile(total, max_tile, align):
    """Largest multiple of `align` that divides `total` and is <= max_tile."""
    t = max(align, min(max_tile, total))
    t = (t // align) * align
    while total % t:
        t -= align
    return t


def cbow_kernel(ctx_ref, emb_ref, w_ref, b_ref, out_ref, mean_ref):
    """One (batch-tile i, vocab-out-tile j) grid step.

    ctx_ref  : (TM, C)  int32  context ids for this batch tile
    emb_ref  : (Ve, D)  f32    full embedding table (resident in VMEM)
    w_ref    : (D, TN)  f32    linear-weight tile (pre-transposed, lane-dense)
    b_ref    : (1, TN)  f32    bias tile
    out_ref  : (TM, TN) f32    logits tile
    mean_ref : (TM, D)  f32    scratch: mean context embedding for this batch
                               tile; computed at j == 0, reused for all j.
    """
    j = pl.program_id(1)

    @pl.when(j == 0)
    def _():
        ctx = ctx_ref[...]                                   # (TM, C)
        tm, n_ctx = ctx.shape
        vocab = emb_ref.shape[0]

        # Single hoisted iota; accumulate 2-D (TM, V) compares per context
        # column (pure VPU; no (TM, C, V) intermediate, no XLU reduction).
        iota_v = jax.lax.broadcasted_iota(jnp.int32, (tm, vocab), 1)
        counts = jnp.zeros((tm, vocab), jnp.float32)
        for c in range(n_ctx):                               # static unroll, C small
            counts += (ctx[:, c:c + 1] == iota_v).astype(jnp.float32)

        # Gather-as-matmul on the MXU: counts @ emb == sum of context rows.
        mean_ref[...] = jnp.dot(
            counts, emb_ref[...], preferred_element_type=jnp.float32
        ) * (1.0 / n_ctx)

    # Linear layer for this vocab tile: (TM, D) @ (D, TN) + (1, TN).
    out_ref[...] = (
        jnp.dot(mean_ref[...], w_ref[...], preferred_element_type=jnp.float32)
        + b_ref[...]
    ).astype(out_ref.dtype)


@functools.partial(jax.jit, static_argnames=("block_m", "block_n"))
def cbow_forward(inputs, emb, weight, bias, *, block_m=128, block_n=1024):
    """CBOW forward.

    inputs : (B, C+1) int   token ids, last column is the target (dropped)
    emb    : (V, D)   f32   embedding table
    weight : (V, D)   f32   nn.Linear weight (out_features, in_features)
    bias   : (V,)     f32   nn.Linear bias
    returns (B, V) f32 logits == emb[inputs[:, :-1]].mean(1) @ weight.T + bias
    """
    B = inputs.shape[0]
    V, D = emb.shape

    ctx = inputs[:, :-1].astype(jnp.int32)        # drop target col in wrapper
    C = ctx.shape[1]

    # ---- padding / tile selection ------------------------------------------
    tm = min(block_m, _round_up(B, 8))            # fill the MXU M dimension
    Bp = _round_up(B, tm)
    Vp = _round_up(V, 128)                        # lane-dense output tiles
    tn = _pick_tile(Vp, block_n, 128)
    Ve = _round_up(V, 8)                          # embedding rows, sublane align

    ctx_p = jnp.zeros((Bp, C), jnp.int32).at[:B].set(ctx)
    emb_p = jnp.zeros((Ve, D), jnp.float32).at[:V].set(emb.astype(jnp.float32))
    # Store the linear weight transposed (D, V) so the (B, V) output is
    # lane-dense (in production you would keep it stored this way).
    w_p = jnp.zeros((D, Vp), jnp.float32).at[:, :V].set(
        weight.astype(jnp.float32).T)
    b_p = jnp.zeros((1, Vp), jnp.float32).at[:, :V].set(
        jnp.reshape(bias, (1, V)).astype(jnp.float32))

    grid = (Bp // tm, Vp // tn)

    flops = 2 * Bp * Ve * D + 2 * Bp * D * Vp
    bytes_accessed = 4 * (ctx_p.size + emb_p.size + w_p.size + b_p.size + Bp * Vp)

    out = pl.pallas_call(
        cbow_kernel,
        out_shape=jax.ShapeDtypeStruct((Bp, Vp), jnp.float32),
        grid_spec=pltpu.PrefetchScalarGridSpec(
            num_scalar_prefetch=0,
            grid=grid,
            in_specs=[
                pl.BlockSpec((tm, C), lambda i, j: (i, 0)),    # ctx (batch-tiled)
                pl.BlockSpec((Ve, D), lambda i, j: (0, 0)),    # emb (resident)
                pl.BlockSpec((D, tn), lambda i, j: (0, j)),    # weight (V-tiled)
                pl.BlockSpec((1, tn), lambda i, j: (0, j)),    # bias   (V-tiled)
            ],
            out_specs=pl.BlockSpec((tm, tn), lambda i, j: (i, j)),
            scratch_shapes=[pltpu.VMEM((tm, D), jnp.float32)],  # mean embedding
        ),
        compiler_params=pltpu.CompilerParams(
            # Batch tiles are independent -> shard across TensorCores (v7x);
            # the V-output axis carries the per-batch-tile scratch -> arbitrary.
            dimension_semantics=("parallel", "arbitrary"),
            vmem_limit_bytes=32 * 1024 * 1024,
        ),
        cost_estimate=pl.CostEstimate(
            flops=flops, transcendentals=0, bytes_accessed=bytes_accessed),
    )(ctx_p, emb_p, w_p, b_p)

    return out[:B, :V]


def cbow_reference(inputs, emb, weight, bias):
    ctx = inputs[:, :-1]
    embedded = emb[ctx]                            # (B, C, D)
    context_mean = jnp.mean(embedded, axis=1)      # (B, D)
    return context_mean @ weight.T + bias          # nn.Linear: x @ W.T + b


if __name__ == "__main__":
    # Small, deterministic synthetic setup (exercises a 2x2 grid: 2 batch
    # tiles x 2 vocab-output tiles).
    vocab_size = 256
    embedding_dim = 64
    batch = 16
    context_plus_target = 5   # 4 context words + 1 target word per row

    key = jax.random.PRNGKey(0)
    k_ids, k_emb, k_w, k_b = jax.random.split(key, 4)

    inputs = jax.random.randint(
        k_ids, (batch, context_plus_target), 0, vocab_size, dtype=jnp.int32)

    # nn.Embedding default init ~ N(0, 1); nn.Linear ~ U(-1/sqrt(D), 1/sqrt(D)).
    emb = jax.random.normal(k_emb, (vocab_size, embedding_dim), jnp.float32)
    bound = 1.0 / (embedding_dim ** 0.5)
    weight = jax.random.uniform(k_w, (vocab_size, embedding_dim), jnp.float32,
                                minval=-bound, maxval=bound)
    bias = jax.random.uniform(k_b, (vocab_size,), jnp.float32,
                              minval=-bound, maxval=bound)

    out = cbow_forward(inputs, emb, weight, bias, block_m=8, block_n=128)
    out = jax.block_until_ready(out)

    ref = cbow_reference(inputs, emb, weight, bias)
    assert out.shape == (batch, vocab_size)
    assert jnp.allclose(out, ref, atol=5e-5, rtol=5e-5)

    print("KERNEL_OK")
</pallas_src>

<mosaic_0001>
module attributes {stable_mosaic.version = 11 : i64} {
  func.func @cbow_kernel(%arg0: i32, %arg1: i32, %arg2: memref<8x4xi32, #tpu.memory_space<vmem>>, %arg3: memref<256x64xf32, #tpu.memory_space<vmem>>, %arg4: memref<64x128xf32, #tpu.memory_space<vmem>>, %arg5: memref<1x128xf32, #tpu.memory_space<vmem>>, %arg6: memref<8x128xf32, #tpu.memory_space<vmem>>, %arg7: memref<8x64xf32, #tpu.memory_space<vmem>>) attributes {dimension_semantics = [#tpu.dimension_semantics<parallel>, #tpu.dimension_semantics<arbitrary>], iteration_bounds = array<i64: 2, 2>, scalar_prefetch = 0 : i64, scratch_operands = 1 : i64, tpu.core_type = #tpu.core_type<tc>, window_params = [{transform_indices = @transform_0, window_bounds = array<i64: 8, 4>}, {pipeline_mode = #tpu.pipeline_mode<synchronous>, transform_indices = @transform_1, window_bounds = array<i64: 256, 64>}, {transform_indices = @transform_2, window_bounds = array<i64: 64, 128>}, {transform_indices = @transform_3, window_bounds = array<i64: 1, 128>}, {transform_indices = @transform_4, window_bounds = array<i64: 8, 128>}]} {
    %c0_i32 = arith.constant 0 : i32
    %0 = arith.cmpi eq, %arg1, %c0_i32 : i32
    %1 = arith.extui %0 : i1 to i32
    %c0_i32_0 = arith.constant 0 : i32
    %2 = arith.cmpi ne, %1, %c0_i32_0 : i32
    scf.if %2 {
      %c0_8 = arith.constant 0 : index
      %c0_9 = arith.constant 0 : index
      %10 = vector.load %arg2[%c0_8, %c0_9] : memref<8x4xi32, #tpu.memory_space<vmem>>, vector<8x4xi32>
      %11 = tpu.iota {dimensions = array<i32: 1>} : vector<8x256xi32>
      %cst_10 = arith.constant 0.000000e+00 : f32
      %12 = vector.broadcast %cst_10 : f32 to vector<8x256xf32>
      %13 = vector.extract_strided_slice %10 {offsets = [0, 0], sizes = [8, 1], strides = [1, 1]} : vector<8x4xi32> to vector<8x1xi32>
      %14 = vector.broadcast %13 : vector<8x1xi32> to vector<8x256xi32>
      %15 = arith.cmpi eq, %14, %11 : vector<8x256xi32>
      %16 = arith.extui %15 : vector<8x256xi1> to vector<8x256xi32>
      %17 = arith.sitofp %16 : vector<8x256xi32> to vector<8x256xf32>
      %18 = arith.addf %12, %17 : vector<8x256xf32>
      %19 = vector.extract_strided_slice %10 {offsets = [0, 1], sizes = [8, 1], strides = [1, 1]} : vector<8x4xi32> to vector<8x1xi32>
      %20 = vector.broadcast %19 : vector<8x1xi32> to vector<8x256xi32>
      %21 = arith.cmpi eq, %20, %11 : vector<8x256xi32>
      %22 = arith.extui %21 : vector<8x256xi1> to vector<8x256xi32>
      %23 = arith.sitofp %22 : vector<8x256xi32> to vector<8x256xf32>
      %24 = arith.addf %18, %23 : vector<8x256xf32>
      %25 = vector.extract_strided_slice %10 {offsets = [0, 2], sizes = [8, 1], strides = [1, 1]} : vector<8x4xi32> to vector<8x1xi32>
      %26 = vector.broadcast %25 : vector<8x1xi32> to vector<8x256xi32>
      %27 = arith.cmpi eq, %26, %11 : vector<8x256xi32>
      %28 = arith.extui %27 : vector<8x256xi1> to vector<8x256xi32>
      %29 = arith.sitofp %28 : vector<8x256xi32> to vector<8x256xf32>
      %30 = arith.addf %24, %29 : vector<8x256xf32>
      %31 = vector.extract_strided_slice %10 {offsets = [0, 3], sizes = [8, 1], strides = [1, 1]} : vector<8x4xi32> to vector<8x1xi32>
      %32 = vector.broadcast %31 : vector<8x1xi32> to vector<8x256xi32>
      %33 = arith.cmpi eq, %32, %11 : vector<8x256xi32>
      %34 = arith.extui %33 : vector<8x256xi1> to vector<8x256xi32>
      %35 = arith.sitofp %34 : vector<8x256xi32> to vector<8x256xf32>
      %36 = arith.addf %30, %35 : vector<8x256xf32>
      %c0_11 = arith.constant 0 : index
      %c0_12 = arith.constant 0 : index
      %37 = vector.load %arg3[%c0_11, %c0_12] : memref<256x64xf32, #tpu.memory_space<vmem>>, vector<256x64xf32>
      %cst_13 = arith.constant dense<0.000000e+00> : vector<8x64xf32>
      %38 = tpu.matmul %36, %37, %cst_13 {dimension_numbers = #tpu.dot_dimension_numbers<[1], [0], [0], [1], [0, 0, 1, 1], [], []>} : vector<8x256xf32>, vector<256x64xf32>, vector<8x64xf32> -> vector<8x64xf32>
      %cst_14 = arith.constant 2.500000e-01 : f32
      %39 = vector.broadcast %cst_14 : f32 to vector<8x64xf32>
      %40 = arith.mulf %38, %39 : vector<8x64xf32>
      %c0_15 = arith.constant 0 : index
      %c0_16 = arith.constant 0 : index
      %41 = vector.load %arg7[%c0_15, %c0_16] : memref<8x64xf32, #tpu.memory_space<vmem>>, vector<8x64xf32>
      tpu.vector_store %arg7[%c0_15, %c0_16], %40 {strides = array<i32>} : memref<8x64xf32, #tpu.memory_space<vmem>>, vector<8x64xf32>,
    } else {
    }
    %c0 = arith.constant 0 : index
    %c0_1 = arith.constant 0 : index
    %3 = vector.load %arg7[%c0, %c0_1] : memref<8x64xf32, #tpu.memory_space<vmem>>, vector<8x64xf32>
    %c0_2 = arith.constant 0 : index
    %c0_3 = arith.constant 0 : index
    %4 = vector.load %arg4[%c0_2, %c0_3] : memref<64x128xf32, #tpu.memory_space<vmem>>, vector<64x128xf32>
    %cst = arith.constant dense<0.000000e+00> : vector<8x128xf32>
    %5 = tpu.matmul %3, %4, %cst {dimension_numbers = #tpu.dot_dimension_numbers<[1], [0], [0], [1], [0, 0, 1, 1], [], []>} : vector<8x64xf32>, vector<64x128xf32>, vector<8x128xf32> -> vector<8x128xf32>
    %c0_4 = arith.constant 0 : index
    %c0_5 = arith.constant 0 : index
    %6 = vector.load %arg5[%c0_4, %c0_5] : memref<1x128xf32, #tpu.memory_space<vmem>>, vector<1x128xf32>
    %7 = vector.broadcast %6 : vector<1x128xf32> to vector<8x128xf32>
    %8 = arith.addf %5, %7 : vector<8x128xf32>
    %c0_6 = arith.constant 0 : index
    %c0_7 = arith.constant 0 : index
    %9 = vector.load %arg6[%c0_6, %c0_7] : memref<8x128xf32, #tpu.memory_space<vmem>>, vector<8x128xf32>
    tpu.vector_store %arg6[%c0_6, %c0_7], %8 {strides = array<i32>} : memref<8x128xf32, #tpu.memory_space<vmem>>, vector<8x128xf32>,
    return
  }
  func.func @transform_0(%arg0: i32, %arg1: i32) -> (i32, i32) {
    %c0_i32 = arith.constant 0 : i32
    %c0_i32_0 = arith.constant 0 : i32
    return %arg0, %c0_i32 : i32, i32
  }
  func.func @transform_1(%arg0: i32, %arg1: i32) -> (i32, i32) {
    %c0_i32 = arith.constant 0 : i32
    %c0_i32_0 = arith.constant 0 : i32
    %c0_i32_1 = arith.constant 0 : i32
    return %c0_i32, %c0_i32_0 : i32, i32
  }
  func.func @transform_2(%arg0: i32, %arg1: i32) -> (i32, i32) {
    %c0_i32 = arith.constant 0 : i32
    %c0_i32_0 = arith.constant 0 : i32
    return %c0_i32, %arg1 : i32, i32
  }
  func.func @transform_3(%arg0: i32, %arg1: i32) -> (i32, i32) {
    %c0_i32 = arith.constant 0 : i32
    %c0_i32_0 = arith.constant 0 : i32
    return %c0_i32, %arg1 : i32, i32
  }
  func.func @transform_4(%arg0: i32, %arg1: i32) -> (i32, i32) {
    %c0_i32 = arith.constant 0 : i32
    return %arg0, %arg1 : i32, i32
  }
}

</mosaic_0001>

<bundles_post_ra>
// kernel: cbow_forward.1
= control target key start
LH: loop header
LB: loop body
LE: loop exit
PB: predicated region body
PF: predicated region fallthrough
CT: control target
= control target key end

     0   :  { %s1347_s0 = inlined_call_operand.vmem [shape: s32[16,4], index: 0, kind: input, shape index: {}]   ;;  %s1348_s1 = inlined_call_operand.vmem [shape: f32[256,64], index: 1, kind: input, shape index: {}]   ;;  %s1349_s2 = inlined_call_operand.vmem [shape: f32[64,256], index: 2, kind: input, shape index: {}]   ;;  %s1350_s3 = inlined_call_operand.vmem [shape: f32[1,256], index: 3, kind: input, shape index: {}]   ;;  %s1351_s4 = inlined_call_operand.hbm [shape: f32[16,256], index: 4, kind: output, shape index: {}]  }
   0x1   :  { %1356 = sst [smem:[#allocation10_spill]] %s1349_s2 }
   0x2   :  { %9 = vsyncpa [#allocation5], 0 }
   0x3   :  { %11 = vsyncpa [#allocation5 + $0x1], 0  ;;  %s1045_s15 = smov 0   ;;  %s1047_s16 = smov 0  }
   0x4   :  { %s1049_s17 = smov 0   ;;  %s1051_s18 = smov 0  }
   0x5   :  { %s1053_s19 = smov 0   ;;  %s1055_s20 = smov 0  }
   0x6   :  { %s1057_s21 = smov 0   ;;  %s1059_s22 = smov 0  }
   0x7   :  { %s1061_s23 = smov 0   ;;  %s1063_s24 = smov 0  }
   0x8 LB: > { %1357 = sst [smem:[#allocation7_spill]] %s1005_s23  ;;  %s666_s25 = sadd.s32 4294967295, %s1009_s24   ;;  %s1009_s24 = sphi %s1063_s24, %s17_s24   ;;  %s1005_s23 = sphi %s1061_s23, %s1370_s23   ;;  %s1001_s22 = sphi %s1059_s22, %s1377_s22   ;;  %s997_s21 = sphi %s1057_s21, %s1368_s21   ;;  %s993_s20 = sphi %s1055_s20, %s1376_s20   ;;  %s989_s19 = sphi %s1053_s19, %s1375_s19   ;;  %s985_s18 = sphi %s1051_s18, %s1374_s18   ;;  %s981_s17 = sphi %s1049_s17, %s1373_s17   ;;  %s977_s16 = sphi %s1047_s16, %s1372_s16   ;;  %s973_s15 = sphi %s1045_s15, %s1371_s15  }
   0x9   : > { %s667_s26 = sadd.s32 4294967294, %s1009_s24   ;;  %s26_s27 = sadd.s32 1, %s1001_s22 }
   0xa   : > { %s29_s28 = sadd.s32 1, %s1005_s23  ;;  %p27_p0 = scmp.ge.s32.totalorder %s26_s27, 2 }
   0xb   : > { %s83_s29 = sadd.s32 1, %s989_s19  ;;  %p90_p1 = scmp.ne.s32.totalorder %s989_s19, %s985_s18 }
   0xc   : > { %p91_p2 = scmp.eq.s32.totalorder %s1009_s24, 0  ;;  %s1379_s27 = smov (%p27_p0, %s26_s27), 0 }
   0xd   : > { %1358 = sst [smem:[#allocation8_spill]] %s1379_s27  ;;  %s1381_s28 = smov (!%p27_p0, %s29_s28), %s1005_s23 }
   0xe   : > { %s80_s30 = ssub.s32 %s1001_s22, %s1379_s27  ;;  %p1108_p3 = por %p91_p2, %p90_p1 }
   0xf   : > { %p31_p4 = scmp.ge.s32.totalorder %s1381_s28, 2  ;;  %p81_p5 = scmp.eq.s32.totalorder %s80_s30, 0 }
  0x10   : > { %s137_s6 = sadd.s32 1, %s981_s17  ;;  %p147_p6 = scmp.ne.s32.totalorder %s981_s17, %s977_s16 }
  0x11   : > { %s1383_s28 = smov (%p31_p4, %s1381_s28), 0  ;;  %p148_p7 = scmp.eq.s32.totalorder %s666_s25, 3 }
  0x12   : > { %1360 = sst [smem:[#allocation9_spill]] %s1383_s28  ;;  %s132_s8 = ssub.s32 %s1005_s23, %s1383_s28 }
  0x13   : > { %s1118_s7 = scalar_select %p81_p5, %s989_s19, %s83_s29  }
  0x14   : > { %s134_s9 = sor.u32 %s132_s8, %s80_s30  ;;  %p153_p8 = scmp.ne.s32.totalorder %s977_s16, %s973_s15 }
  0x15   : > { %p135_p9 = scmp.eq.s32.totalorder %s134_s9, 0  ;;  %p1124_p10 = por %p148_p7, %p147_p6 }
  0x16   : > { %p154_p11 = scmp.eq.s32.totalorder %s667_s26, 3  ;;  %p669_p13 = scmp.ge.s32.totalorder %s1009_s24, 4 }
  0x17   : > { %s1129_s11 = scalar_select %p135_p9, %s981_s17, %s137_s6  }
  0x18   : > { %p1131_p12 = por %p154_p11, %p153_p8  ;;  %173 = sbr.rel (%p669_p13) target bundleno = 45 (0x2d), region = 20 }
  0x1f   : > { %183 = sbr.rel (!%p1108_p3) target bundleno = 45 (0x2d), region = 28  ;;  %s185_s13 = sand.u32 (%p1108_p3), 1, %s989_s19  }
  0x20   : > { %s671_s14 = sshll.u32 (%p1108_p3), %s1001_s22, 3  ;;  %s670_s25 = sshll.u32 (%p1108_p3), %s185_s13, 6 }
  0x21   : > { %s1363_s2 = sld [smem:[#allocation10_spill]] (%p1108_p3)  ;;  %s187_s6 = scalar_lea.vmem (%p1108_p3), [#allocation3], %s670_s25 }
  0x27   : > { %s189_s26 = scalar_lea.vmem %s1363_s2, %s671_s14 }
  0x28   : > { %v231_v0 = vld [vmem:[%s189_s26] sm:$0xff]  ;;  %v233_v1 = vld [vmem:[%s189_s26 + $0x10] sm:$0xff] }
  0x29   : > { %v235_v2 = vld [vmem:[%s189_s26 + $0x20] sm:$0xff]  ;;  %232 = vst [vmem:[%s187_s6] sm:$0xff] %v231_v0  ;;  %234 = vst [vmem:[%s187_s6 + $0x8] sm:$0xff] %v233_v1  ;;  %v237_v3 = vld [vmem:[%s189_s26 + $0x30] sm:$0xff] }
  0x2a   : > { %236 = vst [vmem:[%s187_s6 + $0x10] sm:$0xff] %v235_v2  ;;  %v239_v4 = vld [vmem:[%s189_s26 + $0x40] sm:$0xff]  ;;  %v241_v5 = vld [vmem:[%s189_s26 + $0x50] sm:$0xff]  ;;  %238 = vst [vmem:[%s187_s6 + $0x18] sm:$0xff] %v237_v3 }
  0x2b   : > { %240 = vst [vmem:[%s187_s6 + $0x20] sm:$0xff] %v239_v4  ;;  %242 = vst [vmem:[%s187_s6 + $0x28] sm:$0xff] %v241_v5  ;;  %v243_v6 = vld [vmem:[%s189_s26 + $0x60] sm:$0xff]  ;;  %v245_v7 = vld [vmem:[%s189_s26 + $0x70] sm:$0xff] }
  0x2c   : > { %244 = vst [vmem:[%s187_s6 + $0x30] sm:$0xff] %v243_v6  ;;  %246 = vst [vmem:[%s187_s6 + $0x38] sm:$0xff] %v245_v7 }
  0x2d PF: > { %p672_p0 = scmp.ge.s32.totalorder %s1009_s24, 1  ;;  %p257_p1 = scmp.lt.s32.totalorder %s1009_s24, 5 }
  0x2f   : > { %p258_p2 = pnand %p672_p0, %p257_p1 }
  0x30   : > { %s264_s5 = sand.u32 (!%p258_p2), 1, %s985_s18   ;;  %s1353_s8 = sand.u32 (!%p258_p2), 1, %s977_s16  }
  0x31   : > { %261 = sbr.rel (%p258_p2) target bundleno = 667 (0x29b), region = 70  ;;  %s673_s9 = sshll.u32 (!%p258_p2), %s264_s5, 6 }
  0x32   : > { %s1149_s13 = sshll.u32 (!%p258_p2), %s1353_s8, 3  ;;  %p296_p3 = scmp.lt.s32.totalorder (!%p258_p2), %s997_s21, 1 }
  0x33   : > { %p300_p4 = scmp.lt.s32.totalorder (!%p258_p2), %s993_s20, 1  ;;  %s1164_s5 = scalar_lea.vmem (!%p258_p2), [#allocation3], %s673_s9 }
  0x34   : > { %p676_p5 = scmp.ne.s32.totalorder (!%p258_p2), %s993_s20, 0 }
  0x38   : > { %s297_s14 = scalar_select %p296_p3, %s997_s21, 1 }
  0x39   : > { %s1155_s25 = scalar_select %p300_p4, %s993_s20, 1 }
  0x3a   : > { %s675_s29 = sshll.u32 %s297_s14, 3  ;;  %306 = sbr.rel (%p676_p5) target bundleno = 421 (0x1a5), region = 78  ;;  %v371_v9 = vld [vmem:[%s1348_s1 + $0x80] sm:$0xff] (!%p676_p5)  ;;  %v1011_v10 = vmov (!%p676_p5), 0   ;;  %v1012_v11 = vmov (!%p676_p5), 2   ;;  %v372_v12 = vld [vmem:[%s1348_s1 + $0x88] sm:$0xff] (!%p676_p5)  ;;  %v308_v61 = vlaneseq (!%p676_p5) }
  0x3b   : > { %s299_s6 = scalar_lea.vmem %s1347_s0, %s675_s29  ;;  %894 = vset.pattern.permute.xlu0 (!%p676_p5), %v1011_v10  ;;  %896 = vset.pattern.permute.xlu1 (!%p676_p5), %v1012_v11  ;;  %v355_v13 = vld [vmem:[%s1348_s1] sm:$0xff] (!%p676_p5)  ;;  %v356_v14 = vld [vmem:[%s1348_s1 + $0x8] sm:$0xff] (!%p676_p5)  ;;  %v755_v15 = vpack.c.bf16 (!%p676_p5), %v372_v12, %v371_v9  ;;  %v373_v17 = vld [vmem:[%s1348_s1 + $0x90] sm:$0xff] (!%p676_p5)  ;;  %v1013_v25 = vmov (!%p676_p5), 1   ;;  %v1014_v26 = vmov (!%p676_p5), 3   ;;  %v1015_v4 = vmov (!%p676_p5), 0.0  }
  0x3c   : > { %v307_v8 = vld [vmem:[%s299_s6] sm:$0xff] (!%p676_p5)  ;;  %v757_v16 = vpack.c.bf16 (!%p676_p5), %v356_v14, %v355_v13  ;;  %v374_v18 = vld [vmem:[%s1348_s1 + $0x98] sm:$0xff] (!%p676_p5)  ;;  %v357_v19 = vld [vmem:[%s1348_s1 + $0x10] sm:$0xff] (!%p676_p5)  ;;  %v309_v62 = vand.u32 (!%p676_p5), 127, %v308_v61  ;;  %vm458_vm8 = vcmask (!%p676_p5), 523264  }
  0x3d   : > { %312 = vperm.xlu0 (!%p676_p5), %894, %v307_v8   ;;  %334 = vperm.xlu1 (!%p676_p5), %896, %v307_v8   ;;  %v358_v20 = vld [vmem:[%s1348_s1 + $0x18] sm:$0xff] (!%p676_p5)  ;;  %v375_v21 = vld [vmem:[%s1348_s1 + $0xa0] sm:$0xff] (!%p676_p5)  ;;  %v376_v22 = vld [vmem:[%s1348_s1 + $0xa8] sm:$0xff] (!%p676_p5)  ;;  %v759_v23 = vpack.c.bf16 (!%p676_p5), %v374_v18, %v373_v17 }
  0x3e   : > { %756 = vmatprep.subr.bf16.mxu0 (!%p676_p5), %v755_v15  ;;  %v761_v24 = vpack.c.bf16 (!%p676_p5), %v358_v20, %v357_v19  ;;  %v763_v27 = vpack.c.bf16 (!%p676_p5), %v376_v22, %v375_v21  ;;  %v359_v28 = vld [vmem:[%s1348_s1 + $0x20] sm:$0xff] (!%p676_p5)  ;;  %v360_v29 = vld [vmem:[%s1348_s1 + $0x28] sm:$0xff] (!%p676_p5)  ;;  %v377_v30 = vld [vmem:[%s1348_s1 + $0xb0] sm:$0xff] (!%p676_p5)  ;;  %v310_v63 = vadd.s32 (!%p676_p5), 128, %v309_v62 }
  0x3f   : > { %758 = vmatpush3.bf16.msra.mxu0 (!%p676_p5), %v757_v16  ;;  %v378_v31 = vld [vmem:[%s1348_s1 + $0xb8] sm:$0xff] (!%p676_p5)  ;;  %v765_v32 = vpack.c.bf16 (!%p676_p5), %v360_v29, %v359_v28  ;;  %v361_v34 = vld [vmem:[%s1348_s1 + $0x30] sm:$0xff] (!%p676_p5)  ;;  %v379_v36 = vld [vmem:[%s1348_s1 + $0xc0] sm:$0xff] (!%p676_p5) }
  0x40   : > { %760 = vmatprep.subr.bf16.mxu0 (!%p676_p5), %v759_v23  ;;  %v767_v33 = vpack.c.bf16 (!%p676_p5), %v378_v31, %v377_v30  ;;  %v362_v35 = vld [vmem:[%s1348_s1 + $0x38] sm:$0xff] (!%p676_p5)  ;;  %v380_v37 = vld [vmem:[%s1348_s1 + $0xc8] sm:$0xff] (!%p676_p5)  ;;  %v363_v40 = vld [vmem:[%s1348_s1 + $0x40] sm:$0xff] (!%p676_p5) }
  0x41   : > { %895 = vset.pattern.permute.xlu0 %v1013_v25  ;;  %897 = vset.pattern.permute.xlu1 %v1014_v26  ;;  %v769_v38 = vpack.c.bf16 %v362_v35, %v361_v34  ;;  %v771_v39 = vpack.c.bf16 %v380_v37, %v379_v36  ;;  %v364_v41 = vld [vmem:[%s1348_s1 + $0x48] sm:$0xff]  ;;  %v381_v42 = vld [vmem:[%s1348_s1 + $0xd0] sm:$0xff]  ;;  %v382_v43 = vld [vmem:[%s1348_s1 + $0xd8] sm:$0xff] }
  0x42   : > { %323 = vperm.xlu0 %895, %v307_v8   ;;  %345 = vperm.xlu1 %897, %v307_v8   ;;  %v773_v44 = vpack.c.bf16 %v364_v41, %v363_v40  ;;  %v775_v45 = vpack.c.bf16 %v382_v43, %v381_v42  ;;  %v365_v46 = vld [vmem:[%s1348_s1 + $0x50] sm:$0xff]  ;;  %v366_v47 = vld [vmem:[%s1348_s1 + $0x58] sm:$0xff]  ;;  %v383_v48 = vld [vmem:[%s1348_s1 + $0xe0] sm:$0xff] }
  0x43   : > { %762 = vmatpush3.bf16.msra.mxu0 %v761_v24  ;;  %v384_v49 = vld [vmem:[%s1348_s1 + $0xe8] sm:$0xff]  ;;  %v777_v50 = vpack.c.bf16 %v366_v47, %v365_v46  ;;  %v367_v52 = vld [vmem:[%s1348_s1 + $0x60] sm:$0xff]  ;;  %v385_v54 = vld [vmem:[%s1348_s1 + $0xf0] sm:$0xff] }
  0x44   : > { %764 = vmatprep.subr.bf16.mxu0 %v763_v27  ;;  %v779_v51 = vpack.c.bf16 %v384_v49, %v383_v48  ;;  %v368_v53 = vld [vmem:[%s1348_s1 + $0x68] sm:$0xff]  ;;  %v386_v55 = vld [vmem:[%s1348_s1 + $0xf8] sm:$0xff]  ;;  %v369_v58 = vld [vmem:[%s1348_s1 + $0x70] sm:$0xff] }
  0x45   : > { %v781_v56 = vpack.c.bf16 %v368_v53, %v367_v52  ;;  %v783_v57 = vpack.c.bf16 %v386_v55, %v385_v54  ;;  %v370_v59 = vld [vmem:[%s1348_s1 + $0x78] sm:$0xff] }
  0x46   : > { %898 = vset.pattern.permute.xlu0 %v1014_v26  ;;  %v785_v60 = vpack.c.bf16 %v370_v59, %v369_v58 }
  0x47   : > { %766 = vmatpush3.bf16.msra.mxu0 %v765_v32 }
  0x48   : > { %768 = vmatprep.subr.bf16.mxu0 %v767_v33 }
  0x4b   : > { %770 = vmatpush3.bf16.msra.mxu0 %v769_v38 }
  0x4c   : > { %772 = vmatprep.subr.bf16.mxu0 %v771_v39 }
  0x4f   : > { %774 = vmatpush3.bf16.msra.mxu0 %v773_v44 }
  0x50   : > { %776 = vmatprep.subr.bf16.mxu0 %v775_v45 }
  0x53   : > { %778 = vmatpush3.bf16.msra.mxu0 %v777_v50 }
  0x54   : > { %780 = vmatprep.subr.bf16.mxu0 %v779_v51 }
  0x57   : > { %782 = vmatpush3.bf16.msra.mxu0 %v781_v56 }
  0x58   : > { %784 = vmatprep.subr.bf16.mxu0 %v783_v57 }
  0x5b   : > { %786 = vmatpush3.bf16.msra.mxu0 %v785_v60 }
  0xbc   : > { %v313_v0 = vpop.permute.xlu0 %312  ;;  %v335_v1 = vpop.permute.xlu1 %334 }
  0xbd   : > { %vm314_vm0 = vcmp.eq.s32.totalorder %v313_v0, %v309_v62  ;;  %vm315_vm1 = vcmp.eq.s32.totalorder %v313_v0, %v310_v63  ;;  %vm336_vm2 = vcmp.eq.s32.totalorder %v335_v1, %v309_v62  ;;  %vm337_vm3 = vcmp.eq.s32.totalorder %v335_v1, %v310_v63 }
  0xbe   : > { %v677_v5 = vsel %vm314_vm0, 1.0, %v1015_v4  ;;  %v678_v6 = vsel %vm315_vm1, 1.0, %v1015_v4  ;;  %v681_v11 = vsel %vm336_vm2, 1.0, %v1015_v4  ;;  %v682_v12 = vsel %vm337_vm3, 1.0, %v1015_v4 }
  0xc1   : > { %v324_v2 = vpop.permute.xlu0 %323  ;;  %v346_v3 = vpop.permute.xlu1 %345 }
  0xc2   : > { %vm325_vm4 = vcmp.eq.s32.totalorder %v324_v2, %v309_v62  ;;  %vm326_vm5 = vcmp.eq.s32.totalorder %v324_v2, %v310_v63  ;;  %vm347_vm6 = vcmp.eq.s32.totalorder %v346_v3, %v309_v62  ;;  %vm348_vm7 = vcmp.eq.s32.totalorder %v346_v3, %v310_v63 }
  0xc3   : > { %v679_v7 = vsel %vm325_vm4, 1.0, %v1015_v4  ;;  %v680_v8 = vsel %vm326_vm5, 1.0, %v1015_v4  ;;  %v683_v13 = vsel %vm347_vm6, 1.0, %v1015_v4  ;;  %v684_v14 = vsel %vm348_vm7, 1.0, %v1015_v4 }
  0xc4   : > { %v331_v9 = vadd.f32 %v679_v7, %v677_v5  ;;  %v332_v10 = vadd.f32 %v680_v8, %v678_v6 }
  0xc6   : > { %v342_v15 = vadd.f32 %v681_v11, %v331_v9  ;;  %v343_v16 = vadd.f32 %v682_v12, %v332_v10 }
  0xc8   : > { %v353_v17 = vadd.f32 %v683_v13, %v342_v15  ;;  %v354_v18 = vadd.f32 %v684_v14, %v343_v16 }
  0xca   : > { %451 = vmatprep.mubr.f32.mxu0 %v354_v18 }
  0xcb   : > { %452 = vmatmul.mubr.f32.vlgmr.msra.gmra.mrb[0].mxu0 %v353_v17 }
 0x19e   : > { %v724_v19 = vpop.f32.mrb[0].mxu0 }
 0x19f   : > { %v725_v20 = vpop.f32.mrb[1].mxu0 }
 0x1a0   : > { %v726_v21 = vadd.f32 %v725_v20, %v724_v19 }
 0x1a2   : > { %v457_v22 = vmul.f32 0.25, %v726_v21 }
 0x1a4   : > { %459 = vst.msk [vmem:[#allocation2] sm:$0xff] %vm458_vm8, %v457_v22 }
 0x1a5 PF: > { %v461_v23 = vld [vmem:[%s1164_s5] sm:$0xff]  ;;  %v462_v24 = vld [vmem:[%s1164_s5 + $0x8] sm:$0xff]  ;;  %v463_v25 = vld [vmem:[%s1164_s5 + $0x10] sm:$0xff]  ;;  %v1016_v26 = vmov 0.0|0.0   ;;  %vm1017_vm9 = vmmov 0   ;;  %v1018_v29 = vmov 0.0   ;;  %s1364_s23 = scalar_lea.vmem %s1350_s3, %s1155_s25 }
 0x1a6   : > { %787 = vmatprep.subr.bf16.mxu0 %v1016_v26  ;;  %v788_v27 = vpack.c.bf16 %v462_v24, %v461_v23  ;;  %v464_v28 = vld [vmem:[%s1164_s5 + $0x18] sm:$0xff]  ;;  %752 = vmatprep.mubr.msk.f32.mxu0 %vm1017_vm9, %v1018_v29  ;;  %v465_v31 = vld [vmem:[%s1164_s5 + $0x20] sm:$0xff]  ;;  %v466_v32 = vld [vmem:[%s1164_s5 + $0x28] sm:$0xff]  ;;  %vm476_vm10 = vcmask 523264   ;;  %s688_s2 = sshll.u32 %s997_s21, 1  ;;  %s1365_s26 = scalar_lea.vmem [#allocation4], %s1149_s13 }
 0x1a7   : > { %v791_v30 = vpack.c.bf16 %v464_v28, %v463_v25  ;;  %v794_v33 = vpack.c.bf16 %v466_v32, %v465_v31  ;;  %v467_v34 = vld [vmem:[%s1164_s5 + $0x30] sm:$0xff]  ;;  %v468_v35 = vld [vmem:[%s1164_s5 + $0x38] sm:$0xff]  ;;  %s563_s28 = sadd.s32 %s993_s20, %s688_s2  ;;  %s567_s5 = sshll.u32 %s1365_s26, 4  ;;  %s1286_s5 = int_to_ptr.vmem [resolvable:$true] %s567_s5 }
 0x1a8   : > { %789 = vmatpush3.bf16.msra.mxu0 %v788_v27  ;;  %v797_v36 = vpack.c.bf16 %v468_v35, %v467_v34  ;;  %v685_v38 = vld [vmem:[%s1364_s23] ss:$0 sm:$0xff]  ;;  %s689_s27 = sshll.u32 %s563_s28, 7  ;;  %s1366_s21 = smov %s1365_s26 }
 0x1a9   : > { %790 = vmatprep.subr.bf16.mxu0 %v1016_v26  ;;  %s1284_s18 = scalar_lea.hbm %s1351_s4, %s689_s27  ;;  %s1367_s20 = sand.u32 1, %s977_s16  }
 0x1aa   : > { %s552_s25 = scalar_lea.sflag [#allocation5], %s1367_s20  ;;  %s899_s14 = scalar_lea.vmem %s1286_s5, 128 }
 0x1ab   : > { %v460_v37 = vld [vmem:[#allocation2] sm:$0xff]  ;;  %p900_p6 = scmp.ne.s32.totalorder %s1286_s5, %s899_s14  ;;  %s1019_s29 = smov [#allocation4]  }
 0x1ac   : > { %792 = vmatpush3.bf16.msra.mxu0 %v791_v30  ;;  %s903_s2 = sshll.u32 %s1019_s29, 4  ;;  %s904_s2 = int_to_ptr.vmem [resolvable:$false] %s903_s2 }
 0x1ad   : > { %793 = vmatprep.subr.bf16.mxu0 %v1016_v26  ;;  %p901_p7 = pnand %p900_p6, %p1124_p10  ;;  %s905_s28 = scalar_lea.vmem %s904_s2, 256 }
 0x1ae   : > { %p906_p9 = scmp.lt.s32.totalorder %s1286_s5, %s904_s2  ;;  %p907_p11 = scmp.lt.s32.totalorder %s905_s28, %s899_s14 }
 0x1af   : > { %p902_p8 = pneg %p901_p7 }
 0x1b0   : > { %795 = vmatpush3.bf16.msra.mxu0 %v794_v33  ;;  %p908_p13 = por %p907_p11, %p906_p9 }
 0x1b1   : > { %796 = vmatprep.subr.bf16.mxu0 %v1016_v26 }
 0x1b2   : > { %p909_p0 = pnand %p908_p13, %p902_p8 }
 0x1b4   : > { %798 = vmatpush3.bf16.msra.mxu0 %v797_v36 }
 0x1b7   : > { %753 = vmatmul.mubr.msk.f32.vlgmr.msra.gmra.mrb[0].mxu0 %vm476_vm10, %v460_v37 }
 0x28a   : > { %v546_v39 = vpop.f32.mrb[0].mxu0 }
 0x28b   : > { %v547_v40 = vadd.f32 %v685_v38, %v546_v39  ;;  %v754_v41 = vpop.f32.mrb[1].mxu0 }
 0x28d   : > { %550 = vst [vmem:[%s1366_s21] sm:$0xff] %v547_v40 }
 0x28e   : > { %912 = shalt.err (!%p909_p0)
}
 0x28f   : > { %s913_s13 = scalar_lea.hbm %s1284_s18, 128  ;;  %s917_s23 = scalar_lea.hbm %s1351_s4, 512 }
 0x290   : > { %p914_p1 = scmp.ne.s32.totalorder %s1284_s18, %s913_s13  ;;  %p918_p4 = scmp.lt.u32.totalorder %s1284_s18, %s1351_s4 }
 0x291   : > { %p919_p5 = scmp.lt.u32.totalorder %s917_s23, %s913_s13  ;;  %p921_p7 = scmp.lt.u32.totalorder %s913_s13, %s1284_s18 }
 0x292   : > { %p915_p2 = pnand %p914_p1, %p1124_p10 }
 0x293   : > { %p920_p6 = por %p919_p5, %p918_p4 }
 0x294   : > { %p916_p3 = pneg %p915_p2 }
 0x295   : > { %p922_p8 = por %p921_p7, %p920_p6 }
 0x297   : > { %p923_p9 = pnand %p922_p8, %p916_p3 }
 0x299   : > { %926 = shalt.err (!%p923_p9)
}
 0x29a   : > { %799 = dma.vmem_to_hbm [thread:$0]  (%p1124_p10), %s1286_s5, 128, %s1284_s18, %s552_s25  }
 0x29b PF: > { %p805_p11 = scmp.ge.s32.totalorder %s1009_s24, 2  ;;  %s579_s6 = sand.u32 1, %s973_s15  }
 0x29c   : > { %s580_s8 = scalar_lea.sflag [#allocation5], %s579_s6 }
 0x29d   : > { %p802_p13 = pnand %p805_p11, %p1131_p12 }
 0x29f   : > { %968 = dma.done.wait (!%p802_p13), %s580_s8, 128  }
 0x2a0   : > { %970 = vsyncadd (!%p802_p13), %s580_s8, 4294967168  ;;  %s17_s24 = sadd.s32 1, %s1009_s24   ;;  %s1368_s21 = sld [smem:[#allocation7_spill]] }
 0x2a1   : > { %p14_p0 = scmp.ge.s32.totalorder %s17_s24, 6   ;;  %s1369_s10 = sld [smem:[#allocation8_spill]] }
 0x2a2   : > { %s1370_s23 = sld [smem:[#allocation9_spill]]  ;;  %s1371_s15 = smov %s977_s16 }
 0x2a3   : > { %s1372_s16 = smov %s981_s17  ;;  %s1373_s17 = smov %s1129_s11 }
 0x2a4   : > { %s1374_s18 = smov %s989_s19  ;;  %s1375_s19 = smov %s1118_s7 }
 0x2a5   : > { %s1376_s20 = smov %s1001_s22  ;;  %16 = sbr.rel (!%p14_p0) target bundleno = 8 (0x8), region = 124 }
 0x2a7   : > { %s1377_s22 = smov %s1369_s10 }
 0x2ac   :  { %585 = vsyncpa [#allocation5], 1 }
 0x2ad   :  { %587 = vsyncpa [#allocation5 + $0x1], 1 }

</bundles_post_ra>
